<compile_context>
chip_gen: v7x
topology: tpu7x:2x2x1
jax: 0.10.0
libtpu: 0.0.40
codegen_flags: <defaults>
</compile_context>

<pallas_src>
import functools

import jax
import jax.numpy as jnp
from jax import lax
from jax.experimental import pallas as pl
from jax.experimental.pallas import tpu as pltpu

EPS = 1e-5
LANE = 128


# ------------------------------- Pallas kernel -------------------------------

def _film_block_kernel(x_ref, w1s_ref, w2_ref, t1_ref, film_ref, o_ref, *, H, WCo):
    """Fused FiLM residual block for one stack of Bt images (M = Bt*H rows).

      x_ref   : (M, WCi)        f32   Bt images stacked along rows, lane-dense (w*Cin) lanes
      w1s_ref : (3*WCi, 2*WCo)  bf16  K-stacked conv1 bands | 1x1 shortcut band (BN folded)
      w2_ref  : (3*WCo, WCo)    bf16  K-stacked conv2 bands (BN2 scale folded)
      t1_ref  : (1, WCo)        f32   conv1 BN bias row (tiled over W)
      film_ref: (2, M, WCo)     f32   [0]=per-row FiLM gamma, [1]=per-row gamma*t2+beta+t_s
      o_ref   : (M, WCo)        f32   output
    """
    f32, bf16 = jnp.float32, jnp.bfloat16
    M = x_ref.shape[0]
    row = lax.broadcasted_iota(jnp.int32, (M, 1), 0)
    h = row % H
    not_top = h >= 1           # rows that have a valid row above (same image)
    not_bot = h <= H - 2       # rows that have a valid row below (same image)

    def halo_lhs(a):
        # K-stacked LHS [a[h-1] | a[h] | a[h+1]] for one fused 3x3 banded matmul.
        # Non-negative sublane rolls; image-boundary / wrap rows zeroed by the masks.
        a_dn = jnp.where(not_top, pltpu.roll(a, 1, 0), 0.0)        # row h -> a[h-1]
        a_up = jnp.where(not_bot, pltpu.roll(a, M - 1, 0), 0.0)    # row h -> a[h+1]
        return jnp.concatenate([a_dn, a, a_up], axis=-1).astype(bf16)   # single cast

    x = x_ref[...]                                                     # (M, WCi) f32
    # One matmul: [conv1 pre-activation | 1x1 shortcut]; split at a lane-128 vreg boundary.
    acc1 = jnp.dot(halo_lhs(x), w1s_ref[...], preferred_element_type=f32)   # (M, 2*WCo)
    idn = acc1[:, WCo:]                                                # shortcut (+BN_s scale)
    y1 = jnp.maximum(acc1[:, :WCo] + t1_ref[...], 0.0)                 # conv1 + BN1 + ReLU
    out = jnp.dot(halo_lhs(y1), w2_ref[...], preferred_element_type=f32)    # conv2 (+BN2 scale)
    # FiLM (folded with BN2/BN_s biases), residual add, final ReLU — f32, full lane width.
    o_ref[...] = jnp.maximum(out * film_ref[0] + idn + film_ref[1], 0.0).astype(o_ref.dtype)


# ------------------------------ host-side helpers ----------------------------

def _fold_bn(bn):
    s = bn["weight"] * lax.rsqrt(bn["running_var"] + EPS)
    t = bn["bias"] - bn["running_mean"] * s
    return s, t


def _band_weight(w_k, Wsp):
    """Banded matrix for a 1-D 'same' conv along W at one kernel row.

    w_k: (KW, Cin, Cout) -> B of shape (Wsp*Cin, Wsp*Cout) with
      B[wi*Cin + c, wo*Cout + co] = w_k[wi - wo + (KW-1)//2, c, co]   (0 outside the band)
    so that (M, Wsp*Cin) @ B is that kernel row's contribution, already lane-dense.
    """
    KW, Cin, Cout = w_k.shape
    pad = (KW - 1) // 2
    wi = jnp.arange(Wsp)[:, None]
    wo = jnp.arange(Wsp)[None, :]
    k = wi - wo + pad
    valid = ((k >= 0) & (k < KW)).astype(w_k.dtype)[..., None, None]
    blk = w_k[jnp.clip(k, 0, KW - 1)] * valid                # (Wsp, Wsp, Cin, Cout)
    return jnp.transpose(blk, (0, 2, 1, 3)).reshape(Wsp * Cin, Wsp * Cout)


def _pick_bt(B, H, target_m=256):
    """Largest divisor of B with Bt*H <= target_m (images stacked per grid step).
    target_m=256 fills the v6e/v7x MXU; use 128 on v5e."""
    bt = 1
    for cand in range(1, B + 1):
        if B % cand == 0 and cand * H <= target_m:
            bt = cand
    return bt


@jax.jit
def film_residual_block(x_nchw, params, gamma, beta):
    B, Cin, H, W = x_nchw.shape
    Cout = params["conv1_w"].shape[0]

    # --- pad Cin so W*Cin is a multiple of 128 (full-lane loads; numerically exact) ---
    Cin_p = Cin
    if (W * Cin) % LANE != 0 and LANE % W == 0:
        Cin_p = (-(-(W * Cin) // LANE)) * LANE // W
    x_p = x_nchw if Cin_p == Cin else jnp.pad(
        x_nchw, ((0, 0), (0, Cin_p - Cin), (0, 0), (0, 0)))

    WCi, WCo = W * Cin_p, W * Cout
    Bt = _pick_bt(B, H)
    Bg, M = B // Bt, Bt * H

    # NCHW -> lane-dense stacked slabs (B//Bt, Bt*H, W*Cin_p)
    x3d = jnp.transpose(x_p, (0, 2, 3, 1)).astype(jnp.float32).reshape(Bg, M, WCi)

    s1, t1 = _fold_bn(params["bn1"])
    s2, t2 = _fold_bn(params["bn2"])
    ss, ts = _fold_bn(params["bn_s"])

    def pad_cin(w):   # (Cout, Cin, KH, KW) -> (Cout, Cin_p, KH, KW), zero-padded channels
        return w if Cin_p == Cin else jnp.pad(w, ((0, 0), (0, Cin_p - Cin), (0, 0), (0, 0)))

    # (Cout, Cin, KH, KW) -> (KH, KW, Cin, Cout); fold eval-mode BN scales into the weights.
    w1 = jnp.transpose(pad_cin(params["conv1_w"]), (2, 3, 1, 0)) * s1
    w2 = jnp.transpose(params["conv2_w"], (2, 3, 1, 0)) * s2
    ws = jnp.transpose(pad_cin(params["convs_w"]), (2, 3, 1, 0)) * ss

    # Fused weights: conv bands K-stacked along rows; shortcut folded into extra N columns
    # (only the centre K-block multiplies the un-shifted x, so the off-centre blocks are 0).
    w1_bands = jnp.concatenate([_band_weight(w1[kh], W) for kh in range(3)], axis=0)  # (3*WCi, WCo)
    ws_band = _band_weight(ws[0], W)                                                  # (WCi, WCo)
    ws_cols = jnp.concatenate(
        [jnp.zeros_like(ws_band), ws_band, jnp.zeros_like(ws_band)], axis=0)          # (3*WCi, WCo)
    w1s = jnp.concatenate([w1_bands, ws_cols], axis=1).astype(jnp.bfloat16)           # (3*WCi, 2*WCo)
    w2s = jnp.concatenate([_band_weight(w2[kh], W) for kh in range(3)],
                          axis=0).astype(jnp.bfloat16)                                # (3*WCo, WCo)

    # Epilogue vectors in the lane-dense layout.  t1 is per-channel (resident row); the
    # per-batch FiLM gamma and combined bias are merged into ONE per-step tensor.
    t1_row = jnp.tile(t1, W)[None, :].astype(jnp.float32)                    # (1, WCo)
    g_wc = jnp.tile(gamma, (1, W)).astype(jnp.float32)                       # (B, WCo)
    b_wc = jnp.tile(gamma * t2 + beta + ts, (1, W)).astype(jnp.float32)      # (B, WCo)
    film = jnp.stack([g_wc, b_wc], axis=1)                                   # (B, 2, WCo)
    film = jnp.broadcast_to(film[:, :, None, :], (B, 2, H, WCo))
    film = film.reshape(Bg, Bt, 2, H, WCo).transpose(0, 2, 1, 3, 4).reshape(Bg, 2, M, WCo)

    flops = (2 * B * H * (3 * WCi) * (2 * WCo)        # conv1 + shortcut matmul
             + 2 * B * H * (3 * WCo) * WCo            # conv2 matmul
             + 6 * B * H * WCo)                       # epilogue
    bytes_accessed = (x3d.size * 4 + Bg * M * WCo * 4 + film.size * 4 + t1_row.size * 4
                      + (w1s.size + w2s.size) * 2)

    out3d = pl.pallas_call(
        functools.partial(_film_block_kernel, H=H, WCo=WCo),
        out_shape=jax.ShapeDtypeStruct((Bg, M, WCo), jnp.float32),
        grid=(Bg,),
        in_specs=[
            pl.BlockSpec((None, M, WCi), lambda b: (b, 0, 0)),        # Bt stacked images
            pl.BlockSpec((3 * WCi, 2 * WCo), lambda b: (0, 0)),       # conv1 | shortcut weights
            pl.BlockSpec((3 * WCo, WCo), lambda b: (0, 0)),           # conv2 weights
            pl.BlockSpec((1, WCo), lambda b: (0, 0)),                 # conv1 BN bias row
            pl.BlockSpec((None, 2, M, WCo), lambda b: (b, 0, 0, 0)),  # FiLM gamma + combined bias
        ],
        out_specs=pl.BlockSpec((None, M, WCo), lambda b: (b, 0, 0)),
        compiler_params=pltpu.CompilerParams(dimension_semantics=("parallel",)),
        cost_estimate=pl.CostEstimate(flops=flops, transcendentals=0,
                                      bytes_accessed=bytes_accessed),
    )(x3d, w1s, w2s, t1_row, film)

    return jnp.transpose(out3d.reshape(B, H, W, Cout), (0, 3, 1, 2))   # back to NCHW


# ----------------------- deterministic parameter init -----------------------

def init_params(key, cin, cout):
    ks = jax.random.split(key, 6)

    def bn_params(k):
        k1, k2, k3, k4 = jax.random.split(k, 4)
        return {
            "weight": jax.random.uniform(k1, (cout,), minval=0.5, maxval=1.5),
            "bias": 0.1 * jax.random.normal(k2, (cout,)),
            "running_mean": 0.1 * jax.random.normal(k3, (cout,)),
            "running_var": jax.random.uniform(k4, (cout,), minval=0.5, maxval=1.5),
        }

    return {
        "conv1_w": 0.1 * jax.random.normal(ks[0], (cout, cin, 3, 3)),
        "conv2_w": 0.1 * jax.random.normal(ks[1], (cout, cout, 3, 3)),
        "convs_w": 0.1 * jax.random.normal(ks[2], (cout, cin, 1, 1)),
        "bn1": bn_params(ks[3]),
        "bn2": bn_params(ks[4]),
        "bn_s": bn_params(ks[5]),
    }


# ----------------------------- pure-JAX reference ---------------------------

def ref_forward(x_nchw, params, gamma, beta, *, mxu_dtype=None):
    """Reference forward pass.  mxu_dtype=None -> exact f32 semantics of the PyTorch module
    (BN folding is algebraically exact).  mxu_dtype=jnp.bfloat16 -> mirrors the kernel's MXU
    precision (operands rounded to bf16 after BN-scale folding, f32 accumulation)."""
    x = jnp.transpose(x_nchw, (0, 2, 3, 1)).astype(jnp.float32)

    def rnd(a):
        return a if mxu_dtype is None else a.astype(mxu_dtype).astype(jnp.float32)

    def conv(inp, w_hwio, pad):
        return lax.conv_general_dilated(
            rnd(inp), rnd(w_hwio), window_strides=(1, 1),
            padding=[(pad, pad), (pad, pad)],
            dimension_numbers=("NHWC", "HWIO", "NHWC"),
            precision=lax.Precision.HIGHEST)

    s1, t1 = _fold_bn(params["bn1"])
    s2, t2 = _fold_bn(params["bn2"])
    ss, ts = _fold_bn(params["bn_s"])
    w1 = jnp.transpose(params["conv1_w"], (2, 3, 1, 0)) * s1
    w2 = jnp.transpose(params["conv2_w"], (2, 3, 1, 0)) * s2
    ws = jnp.transpose(params["convs_w"], (2, 3, 1, 0)) * ss

    y = jax.nn.relu(conv(x, w1, 1) + t1)
    y = conv(y, w2, 1) + t2
    idn = conv(x, ws, 0) + ts
    y = gamma[:, None, None, :] * y + beta[:, None, None, :]
    out = jax.nn.relu(y + idn)
    return jnp.transpose(out, (0, 3, 1, 2))


# ---------------------------------- main ------------------------------------

if __name__ == "__main__":
    key = jax.random.PRNGKey(0)
    kx, kg, kb, kp = jax.random.split(key, 4)

    B, Cin, Cout, H, W = 2, 4, 8, 16, 16          # in_channels=4, out_channels=8, stride=1
    x = jax.random.normal(kx, (B, Cin, H, W), dtype=jnp.float32)
    gamma = 1.0 + 0.5 * jax.random.normal(kg, (B, Cout), dtype=jnp.float32)
    beta = 0.1 * jax.random.normal(kb, (B, Cout), dtype=jnp.float32)
    params = init_params(kp, Cin, Cout)

    out = jax.block_until_ready(film_residual_block(x, params, gamma, beta))
    assert out.shape == (B, Cout, H, W), out.shape

    # Tight check vs a reference that mirrors the kernel's MXU precision (bf16 operands,
    # f32 accumulation, BN scales folded into the weights before the cast).
    ref_bf16 = ref_forward(x, params, gamma, beta, mxu_dtype=jnp.bfloat16)
    assert jnp.allclose(out, ref_bf16, rtol=5e-3, atol=5e-3), \
        float(jnp.max(jnp.abs(out - ref_bf16)))

    # Loose sanity check vs the exact f32 module semantics (difference is only the intentional
    # bf16 quantization of the MXU operands).
    ref_f32 = ref_forward(x, params, gamma, beta)
    assert jnp.allclose(out, ref_f32, rtol=1e-1, atol=1e-1), \
        float(jnp.max(jnp.abs(out - ref_f32)))

    print("KERNEL_OK")
</pallas_src>

<mosaic_0001>
module attributes {stable_mosaic.version = 11 : i64} {
  func.func @_film_block_kernel(%arg0: i32, %arg1: memref<1x32x128xf32, #tpu.memory_space<vmem>>, %arg2: memref<384x256xbf16, #tpu.memory_space<vmem>>, %arg3: memref<384x128xbf16, #tpu.memory_space<vmem>>, %arg4: memref<1x128xf32, #tpu.memory_space<vmem>>, %arg5: memref<1x2x32x128xf32, #tpu.memory_space<vmem>>, %arg6: memref<1x32x128xf32, #tpu.memory_space<vmem>>) attributes {dimension_semantics = [#tpu.dimension_semantics<parallel>], iteration_bounds = array<i64: 1>, scalar_prefetch = 0 : i64, scratch_operands = 0 : i64, tpu.core_type = #tpu.core_type<tc>, window_params = [{transform_indices = @transform_0, window_bounds = array<i64: 1, 32, 128>}, {pipeline_mode = #tpu.pipeline_mode<synchronous>, transform_indices = @transform_1, window_bounds = array<i64: 384, 256>}, {pipeline_mode = #tpu.pipeline_mode<synchronous>, transform_indices = @transform_2, window_bounds = array<i64: 384, 128>}, {pipeline_mode = #tpu.pipeline_mode<synchronous>, transform_indices = @transform_3, window_bounds = array<i64: 1, 128>}, {transform_indices = @transform_4, window_bounds = array<i64: 1, 2, 32, 128>}, {transform_indices = @transform_5, window_bounds = array<i64: 1, 32, 128>}]} {
    %0 = tpu.iota {dimensions = array<i32: 0>} : vector<32x1xi32>
    %c16_i32 = arith.constant 16 : i32
    %c0_i32 = arith.constant 0 : i32
    %1 = arith.cmpi eq, %c16_i32, %c0_i32 : i32
    %c1_i32 = arith.constant 1 : i32
    %2 = arith.select %1, %c1_i32, %c16_i32 : i32
    %3 = vector.broadcast %2 : i32 to vector<32x1xi32>
    %4 = arith.remsi %0, %3 : vector<32x1xi32>
    %c0_i32_0 = arith.constant 0 : i32
    %5 = vector.broadcast %c0_i32_0 : i32 to vector<32x1xi32>
    %6 = arith.cmpi ne, %4, %5 : vector<32x1xi32>
    %c0_i32_1 = arith.constant 0 : i32
    %7 = vector.broadcast %c0_i32_1 : i32 to vector<32x1xi32>
    %8 = arith.cmpi slt, %4, %7 : vector<32x1xi32>
    %c0_i32_2 = arith.constant 0 : i32
    %9 = arith.cmpi slt, %2, %c0_i32_2 : i32
    %10 = vector.broadcast %9 : i1 to vector<32x1xi1>
    %11 = vector.broadcast %10 : vector<32x1xi1> to vector<32x1xi1>
    %12 = arith.xori %8, %11 : vector<32x1xi1>
    %13 = arith.andi %12, %6 : vector<32x1xi1>
    %14 = vector.broadcast %2 : i32 to vector<32x1xi32>
    %15 = arith.addi %4, %14 : vector<32x1xi32>
    %16 = arith.select %13, %15, %4 : vector<32x1xi1>, vector<32x1xi32>
    %c1_i32_3 = arith.constant 1 : i32
    %17 = vector.broadcast %c1_i32_3 : i32 to vector<32x1xi32>
    %18 = arith.cmpi sge, %16, %17 : vector<32x1xi32>
    %c14_i32 = arith.constant 14 : i32
    %19 = vector.broadcast %c14_i32 : i32 to vector<32x1xi32>
    %20 = arith.cmpi sle, %16, %19 : vector<32x1xi32>
    %c0 = arith.constant 0 : index
    %c0_4 = arith.constant 0 : index
    %c0_5 = arith.constant 0 : index
    %21 = vector.load %arg1[%c0, %c0_4, %c0_5] : memref<1x32x128xf32, #tpu.memory_space<vmem>>, vector<1x32x128xf32>
    %22 = vector.shape_cast %21 : vector<1x32x128xf32> to vector<32x128xf32>
    %c1_i32_6 = arith.constant 1 : i32
    %23 = tpu.dynamic_rotate %22 by %c1_i32_6 dim 0 : vector<32x128xf32>, i32 -> vector<32x128xf32>
    %cst = arith.constant 0.000000e+00 : f32
    %24 = vector.shape_cast %18 : vector<32x1xi1> to vector<32x1xi1>
    %25 = vector.broadcast %24 : vector<32x1xi1> to vector<32x128xi1>
    %26 = vector.broadcast %cst : f32 to vector<32x128xf32>
    %27 = arith.select %25, %23, %26 : vector<32x128xi1>, vector<32x128xf32>
    %c31_i32 = arith.constant 31 : i32
    %28 = tpu.dynamic_rotate %22 by %c31_i32 dim 0 : vector<32x128xf32>, i32 -> vector<32x128xf32>
    %cst_7 = arith.constant 0.000000e+00 : f32
    %29 = vector.shape_cast %20 : vector<32x1xi1> to vector<32x1xi1>
    %30 = vector.broadcast %29 : vector<32x1xi1> to vector<32x128xi1>
    %31 = vector.broadcast %cst_7 : f32 to vector<32x128xf32>
    %32 = arith.select %30, %28, %31 : vector<32x128xi1>, vector<32x128xf32>
    %33 = tpu.concatenate %27, %22, %32 in 1 : vector<32x128xf32>, vector<32x128xf32>, vector<32x128xf32> -> vector<32x384xf32>
    %34 = arith.truncf %33 : vector<32x384xf32> to vector<32x384xbf16>
    %c0_8 = arith.constant 0 : index
    %c0_9 = arith.constant 0 : index
    %35 = vector.load %arg2[%c0_8, %c0_9] : memref<384x256xbf16, #tpu.memory_space<vmem>>, vector<384x256xbf16>
    %cst_10 = arith.constant dense<0.000000e+00> : vector<32x256xf32>
    %36 = tpu.matmul %34, %35, %cst_10 {dimension_numbers = #tpu.dot_dimension_numbers<[1], [0], [0], [1], [0, 0, 1, 1], [], []>} : vector<32x384xbf16>, vector<384x256xbf16>, vector<32x256xf32> -> vector<32x256xf32>
    %37 = vector.extract_strided_slice %36 {offsets = [0, 128], sizes = [32, 128], strides = [1, 1]} : vector<32x256xf32> to vector<32x128xf32>
    %38 = vector.extract_strided_slice %36 {offsets = [0, 0], sizes = [32, 128], strides = [1, 1]} : vector<32x256xf32> to vector<32x128xf32>
    %c0_11 = arith.constant 0 : index
    %c0_12 = arith.constant 0 : index
    %39 = vector.load %arg4[%c0_11, %c0_12] : memref<1x128xf32, #tpu.memory_space<vmem>>, vector<1x128xf32>
    %40 = vector.broadcast %39 : vector<1x128xf32> to vector<32x128xf32>
    %41 = arith.addf %38, %40 : vector<32x128xf32>
    %cst_13 = arith.constant 0.000000e+00 : f32
    %42 = vector.broadcast %cst_13 : f32 to vector<32x128xf32>
    %43 = arith.maximumf %41, %42 : vector<32x128xf32>
    %c1_i32_14 = arith.constant 1 : i32
    %44 = tpu.dynamic_rotate %43 by %c1_i32_14 dim 0 : vector<32x128xf32>, i32 -> vector<32x128xf32>
    %cst_15 = arith.constant 0.000000e+00 : f32
    %45 = vector.shape_cast %18 : vector<32x1xi1> to vector<32x1xi1>
    %46 = vector.broadcast %45 : vector<32x1xi1> to vector<32x128xi1>
    %47 = vector.broadcast %cst_15 : f32 to vector<32x128xf32>
    %48 = arith.select %46, %44, %47 : vector<32x128xi1>, vector<32x128xf32>
    %c31_i32_16 = arith.constant 31 : i32
    %49 = tpu.dynamic_rotate %43 by %c31_i32_16 dim 0 : vector<32x128xf32>, i32 -> vector<32x128xf32>
    %cst_17 = arith.constant 0.000000e+00 : f32
    %50 = vector.shape_cast %20 : vector<32x1xi1> to vector<32x1xi1>
    %51 = vector.broadcast %50 : vector<32x1xi1> to vector<32x128xi1>
    %52 = vector.broadcast %cst_17 : f32 to vector<32x128xf32>
    %53 = arith.select %51, %49, %52 : vector<32x128xi1>, vector<32x128xf32>
    %54 = tpu.concatenate %48, %43, %53 in 1 : vector<32x128xf32>, vector<32x128xf32>, vector<32x128xf32> -> vector<32x384xf32>
    %55 = arith.truncf %54 : vector<32x384xf32> to vector<32x384xbf16>
    %c0_18 = arith.constant 0 : index
    %c0_19 = arith.constant 0 : index
    %56 = vector.load %arg3[%c0_18, %c0_19] : memref<384x128xbf16, #tpu.memory_space<vmem>>, vector<384x128xbf16>
    %cst_20 = arith.constant dense<0.000000e+00> : vector<32x128xf32>
    %57 = tpu.matmul %55, %56, %cst_20 {dimension_numbers = #tpu.dot_dimension_numbers<[1], [0], [0], [1], [0, 0, 1, 1], [], []>} : vector<32x384xbf16>, vector<384x128xbf16>, vector<32x128xf32> -> vector<32x128xf32>
    %c0_21 = arith.constant 0 : index
    %c0_22 = arith.constant 0 : index
    %c0_23 = arith.constant 0 : index
    %c0_24 = arith.constant 0 : index
    %58 = vector.load %arg5[%c0_21, %c0_22, %c0_23, %c0_24] : memref<1x2x32x128xf32, #tpu.memory_space<vmem>>, vector<1x1x32x128xf32>
    %59 = vector.shape_cast %58 : vector<1x1x32x128xf32> to vector<32x128xf32>
    %60 = arith.mulf %57, %59 : vector<32x128xf32>
    %61 = arith.addf %60, %37 : vector<32x128xf32>
    %c0_25 = arith.constant 0 : index
    %c1 = arith.constant 1 : index
    %c0_26 = arith.constant 0 : index
    %c0_27 = arith.constant 0 : index
    %62 = vector.load %arg5[%c0_25, %c1, %c0_26, %c0_27] : memref<1x2x32x128xf32, #tpu.memory_space<vmem>>, vector<1x1x32x128xf32>
    %63 = vector.shape_cast %62 : vector<1x1x32x128xf32> to vector<32x128xf32>
    %64 = arith.addf %61, %63 : vector<32x128xf32>
    %cst_28 = arith.constant 0.000000e+00 : f32
    %65 = vector.broadcast %cst_28 : f32 to vector<32x128xf32>
    %66 = arith.maximumf %64, %65 : vector<32x128xf32>
    %c0_29 = arith.constant 0 : index
    %c0_30 = arith.constant 0 : index
    %c0_31 = arith.constant 0 : index
    %67 = vector.load %arg6[%c0_29, %c0_30, %c0_31] : memref<1x32x128xf32, #tpu.memory_space<vmem>>, vector<1x32x128xf32>
    %68 = vector.shape_cast %67 : vector<1x32x128xf32> to vector<32x128xf32>
    %69 = vector.shape_cast %66 : vector<32x128xf32> to vector<1x32x128xf32>
    tpu.vector_store %arg6[%c0_29, %c0_30, %c0_31], %69 {strides = array<i32>} : memref<1x32x128xf32, #tpu.memory_space<vmem>>, vector<1x32x128xf32>,
    return
  }
  func.func @transform_0(%arg0: i32) -> (i32, i32, i32) {
    %c0_i32 = arith.constant 0 : i32
    %c0_i32_0 = arith.constant 0 : i32
    %c0_i32_1 = arith.constant 0 : i32
    return %arg0, %c0_i32, %c0_i32_0 : i32, i32, i32
  }
  func.func @transform_1(%arg0: i32) -> (i32, i32) {
    %c0_i32 = arith.constant 0 : i32
    %c0_i32_0 = arith.constant 0 : i32
    %c0_i32_1 = arith.constant 0 : i32
    return %c0_i32, %c0_i32_0 : i32, i32
  }
  func.func @transform_2(%arg0: i32) -> (i32, i32) {
    %c0_i32 = arith.constant 0 : i32
    %c0_i32_0 = arith.constant 0 : i32
    %c0_i32_1 = arith.constant 0 : i32
    return %c0_i32, %c0_i32_0 : i32, i32
  }
  func.func @transform_3(%arg0: i32) -> (i32, i32) {
    %c0_i32 = arith.constant 0 : i32
    %c0_i32_0 = arith.constant 0 : i32
    %c0_i32_1 = arith.constant 0 : i32
    return %c0_i32, %c0_i32_0 : i32, i32
  }
  func.func @transform_4(%arg0: i32) -> (i32, i32, i32, i32) {
    %c0_i32 = arith.constant 0 : i32
    %c0_i32_0 = arith.constant 0 : i32
    %c0_i32_1 = arith.constant 0 : i32
    %c0_i32_2 = arith.constant 0 : i32
    return %arg0, %c0_i32, %c0_i32_0, %c0_i32_1 : i32, i32, i32, i32
  }
  func.func @transform_5(%arg0: i32) -> (i32, i32, i32) {
    %c0_i32 = arith.constant 0 : i32
    %c0_i32_0 = arith.constant 0 : i32
    %c0_i32_1 = arith.constant 0 : i32
    return %arg0, %c0_i32, %c0_i32_0 : i32, i32, i32
  }
}

</mosaic_0001>

<bundles_post_ra>
// kernel: tile.18
= control target key start
LH: loop header
LB: loop body
LE: loop exit
PB: predicated region body
PF: predicated region fallthrough
CT: control target
= control target key end

     0   :  { %s28_s0 = inlined_call_operand.vmem [shape: f32[8], index: 0, kind: input, shape index: {}]   ;;  %s29_s1 = inlined_call_operand.vmem [shape: f32[16,8], index: 1, kind: output, shape index: {}]  }
   0x1   :  { %v4_v0 = vld [vmem:[%s28_s0] ss:$0 sm:$0xff] }
   0x2   :  { %5 = vst [vmem:[%s29_s1] sm:$0xff] %v4_v0  ;;  %8 = vst [vmem:[%s29_s1 + $0x8] sm:$0xff] %v4_v0 }

// kernel: tile.19
= control target key start
LH: loop header
LB: loop body
LE: loop exit
PB: predicated region body
PF: predicated region fallthrough
CT: control target
= control target key end

     0   :  { %s131_s10 = smov 120   ;;  %s132_s11 = smov 104   ;;  %vm3_vm0 = vcmask 64512   ;;  %vm9_vm1 = vcmask 1048512   ;;  %vm15_vm2 = vcmask 982912   ;;  %vm21_vm3 = vcmask 917312   ;;  %s207_s0 = inlined_call_operand.vmem [shape: f32[16,8], index: 0, kind: input, shape index: {}]   ;;  %s208_s1 = inlined_call_operand.vmem [shape: f32[1,128], index: 1, kind: output, shape index: {}]  }
   0x1   :  { %v101_v0 = vld [vmem:[%s207_s0 + $0xf] sm:$0x1]   ;;  %v103_v1 = vld [vmem:[%s207_s0 + $0xd] sm:$0x1]   ;;  %v102_v2 = vld [vmem:[%s207_s0 + $0xe] sm:$0x1]  }
   0x2   :  { %7 = vrot.lane.b32.xlu0 %v101_v0, %s131_s10  ;;  %19 = vrot.lane.b32.xlu1 %v103_v1, %s132_s11  ;;  %v104_v3 = vld [vmem:[%s207_s0 + $0xc] sm:$0x1]   ;;  %s133_s16 = smov 112   ;;  %s134_s17 = smov 96   ;;  %v105_v4 = vld [vmem:[%s207_s0 + $0xb] sm:$0x1]  }
   0x3   :  { %v106_v5 = vld [vmem:[%s207_s0 + $0xa] sm:$0x1]   ;;  %v2_v6 = vld [vmem:[%s207_s0] sm:$0x1]   ;;  %s135_s24 = smov 88   ;;  %s136_s25 = smov 80  }
   0x4   :  { %4 = vst.msk [vmem:[#allocation0] sm:$0x1] %vm3_vm0, %v2_v6   ;;  %v107_v7 = vld [vmem:[%s207_s0 + $0x9] sm:$0x1]   ;;  %v108_v8 = vld [vmem:[%s207_s0 + $0x8] sm:$0x1]  }
   0x5   :  { %s137_s30 = smov 72   ;;  %s138_s2 = smov 64   ;;  %v109_v9 = vld [vmem:[%s207_s0 + $0x7] sm:$0x1]   ;;  %v110_v10 = vld [vmem:[%s207_s0 + $0x6] sm:$0x1]  }
   0x6   :  { %13 = vrot.lane.b32.xlu0 %v102_v2, %s133_s16  ;;  %25 = vrot.lane.b32.xlu1 %v104_v3, %s134_s17  ;;  %s139_s7 = smov 56   ;;  %s140_s8 = smov 48   ;;  %v111_v11 = vld [vmem:[%s207_s0 + $0x5] sm:$0x1]   ;;  %v112_v12 = vld [vmem:[%s207_s0 + $0x4] sm:$0x1]  }
   0x7   :  { %s141_s13 = smov 40   ;;  %s142_s14 = smov 32   ;;  %v113_v13 = vld [vmem:[%s207_s0 + $0x3] sm:$0x1]   ;;  %v114_v14 = vld [vmem:[%s207_s0 + $0x2] sm:$0x1]  }
   0x8   :  { %s143_s19 = smov 24   ;;  %s144_s20 = smov 16   ;;  %v115_v15 = vld [vmem:[%s207_s0 + $0x1] sm:$0x1]   ;;  %vm27_vm4 = vcmask 851712   ;;  %vm33_vm5 = vcmask 786112  }
   0x9   :  { %s145_s0 = smov 8   ;;  %vm39_vm6 = vcmask 720512   ;;  %vm45_vm7 = vcmask 654912   ;;  %vm51_vm8 = vcmask 589312   ;;  %vm57_vm9 = vcmask 523712  }
   0xa   :  { %31 = vrot.lane.b32.xlu0 %v105_v4, %s135_s24  ;;  %37 = vrot.lane.b32.xlu1 %v106_v5, %s136_s25  ;;  %vm63_vm10 = vcmask 458112   ;;  %vm69_vm11 = vcmask 392512   ;;  %vm75_vm12 = vcmask 326912   ;;  %vm81_vm13 = vcmask 261312  }
   0xb   :  { %vm87_vm14 = vcmask 195712   ;;  %vm93_vm15 = vcmask 130112  }
   0xe   :  { %43 = vrot.lane.b32.xlu0 %v107_v7, %s137_s30  ;;  %49 = vrot.lane.b32.xlu1 %v108_v8, %s138_s2 }
  0x12   :  { %55 = vrot.lane.b32.xlu0 %v109_v9, %s139_s7  ;;  %61 = vrot.lane.b32.xlu1 %v110_v10, %s140_s8 }
  0x16   :  { %67 = vrot.lane.b32.xlu0 %v111_v11, %s141_s13  ;;  %73 = vrot.lane.b32.xlu1 %v112_v12, %s142_s14 }
  0x1a   :  { %79 = vrot.lane.b32.xlu0 %v113_v13, %s143_s19  ;;  %85 = vrot.lane.b32.xlu1 %v114_v14, %s144_s20 }
  0x1e   :  { %91 = vrot.lane.b32.xlu0 %v115_v15, %s145_s0 }
  0x74   :  { %v8_v16 = vpop.permute.xlu0 %7   ;;  %v20_v17 = vpop.permute.xlu1 %19  }
  0x75   :  { %10 = vst.msk [vmem:[#allocation0] sm:$0x1] %vm9_vm1, %v8_v16  }
  0x78   :  { %v14_v18 = vpop.permute.xlu0 %13   ;;  %v26_v19 = vpop.permute.xlu1 %25  }
  0x79   :  { %16 = vst.msk [vmem:[#allocation0] sm:$0x1] %vm15_vm2, %v14_v18  }
  0x7a   :  { %22 = vst.msk [vmem:[#allocation0] sm:$0x1] %vm21_vm3, %v20_v17  }
  0x7b   :  { %28 = vst.msk [vmem:[#allocation0] sm:$0x1] %vm27_vm4, %v26_v19  }
  0x7c   :  { %v32_v20 = vpop.permute.xlu0 %31   ;;  %v38_v21 = vpop.permute.xlu1 %37  }
  0x7d   :  { %34 = vst.msk [vmem:[#allocation0] sm:$0x1] %vm33_vm5, %v32_v20  }
  0x7e   :  { %40 = vst.msk [vmem:[#allocation0] sm:$0x1] %vm39_vm6, %v38_v21  }
  0x80   :  { %v44_v22 = vpop.permute.xlu0 %43   ;;  %v50_v23 = vpop.permute.xlu1 %49  }
  0x81   :  { %46 = vst.msk [vmem:[#allocation0] sm:$0x1] %vm45_vm7, %v44_v22  }
  0x82   :  { %52 = vst.msk [vmem:[#allocation0] sm:$0x1] %vm51_vm8, %v50_v23  }
  0x84   :  { %v56_v24 = vpop.permute.xlu0 %55   ;;  %v62_v25 = vpop.permute.xlu1 %61  }
  0x85   :  { %58 = vst.msk [vmem:[#allocation0] sm:$0x1] %vm57_vm9, %v56_v24  }
  0x86   :  { %64 = vst.msk [vmem:[#allocation0] sm:$0x1] %vm63_vm10, %v62_v25  }
  0x88   :  { %v68_v26 = vpop.permute.xlu0 %67   ;;  %v74_v27 = vpop.permute.xlu1 %73  }
  0x89   :  { %70 = vst.msk [vmem:[#allocation0] sm:$0x1] %vm69_vm11, %v68_v26  }
  0x8a   :  { %76 = vst.msk [vmem:[#allocation0] sm:$0x1] %vm75_vm12, %v74_v27  }
  0x8c   :  { %v80_v28 = vpop.permute.xlu0 %79   ;;  %v86_v29 = vpop.permute.xlu1 %85  }
  0x8d   :  { %82 = vst.msk [vmem:[#allocation0] sm:$0x1] %vm81_vm13, %v80_v28  }
  0x8e   :  { %88 = vst.msk [vmem:[#allocation0] sm:$0x1] %vm87_vm14, %v86_v29  }
  0x90   :  { %v92_v30 = vpop.permute.xlu0 %91  }
  0x91   :  { %94 = vst.msk [vmem:[#allocation0] sm:$0x1] %vm93_vm15, %v92_v30  }
  0x98   :  { %v98_v31 = vld [vmem:[#allocation0] sm:$0x1] }
  0x99   :  { %100 = vst [vmem:[%s208_s1] sm:$0x1] %v98_v31 }

// kernel: film_residual_block.1
= control target key start
LH: loop header
LB: loop body
LE: loop exit
PB: predicated region body
PF: predicated region fallthrough
CT: control target
= control target key end

     0   :  { %v1161_v1 = vmov 0   ;;  %v21_v17 = vlaneseq  ;;  %vm1162_vm2 = vmmov 1   ;;  %s1582_s1 = inlined_call_operand.vmem [shape: bf16[384,256], index: 1, kind: input, shape index: {}]   ;;  %s1583_s0 = inlined_call_operand.vmem [shape: f32[1,32,128], index: 0, kind: input, shape index: {}]   ;;  %s1584_s2 = inlined_call_operand.vmem [shape: bf16[384,128], index: 2, kind: input, shape index: {}]   ;;  %s1585_s3 = inlined_call_operand.vmem [shape: f32[1,128], index: 3, kind: input, shape index: {}]   ;;  %s1586_s4 = inlined_call_operand.vmem [shape: f32[1,2,32,128], index: 4, kind: input, shape index: {}]   ;;  %s1587_s5 = inlined_call_operand.vmem [shape: f32[1,32,128], index: 5, kind: output, shape index: {}]  }
   0x1   :  { %v1065_v0 = vld [vmem:[%s1582_s1 + $0x4] ss:$8 sps:$4 sm:$0xff]   ;;  %507 = vmatprep.mubr.bf16.mxu1 %v1161_v1  ;;  %v1067_v2 = vld [vmem:[%s1582_s1] ss:$8 sps:$4 sm:$0xff]   ;;  %v1068_v3 = vld [vmem:[%s1582_s1 + $0x14] ss:$8 sps:$4 sm:$0xff]  }
   0x2   :  { %422 = vmatprep.subr.bf16.mxu0 %v1065_v0  ;;  %v1070_v4 = vld [vmem:[%s1582_s1 + $0x10] ss:$8 sps:$4 sm:$0xff]   ;;  %v1071_v5 = vld [vmem:[%s1582_s1 + $0x24] ss:$8 sps:$4 sm:$0xff]   ;;  %v1073_v6 = vld [vmem:[%s1582_s1 + $0x20] ss:$8 sps:$4 sm:$0xff]  }
   0x3   :  { %423 = vmatpush1.bf16.msra.mxu0 %v1067_v2  ;;  %v1074_v7 = vld [vmem:[%s1582_s1 + $0x34] ss:$8 sps:$4 sm:$0xff]   ;;  %v1076_v8 = vld [vmem:[%s1582_s1 + $0x30] ss:$8 sps:$4 sm:$0xff]   ;;  %v1089_v9 = vld [vmem:[%s1582_s1 + $0x104] ss:$8 sps:$4 sm:$0xff]  }
   0x4   :  { %424 = vmatprep.subr.bf16.mxu0 %v1068_v3  ;;  %v1091_v10 = vld [vmem:[%s1582_s1 + $0x100] ss:$8 sps:$4 sm:$0xff]   ;;  %v1077_v11 = vld [vmem:[%s1582_s1 + $0x44] ss:$8 sps:$4 sm:$0xff]   ;;  %475 = vmatprep.subr.bf16.mxu1 %v1089_v9  ;;  %v1095_v12 = vld [vmem:[%s1582_s1 + $0x114] ss:$8 sps:$4 sm:$0xff]  }
   0x5   :  { %476 = vmatpush1.bf16.msra.mxu1 %v1091_v10  ;;  %v1097_v13 = vld [vmem:[%s1582_s1 + $0x110] ss:$8 sps:$4 sm:$0xff]   ;;  %v1079_v14 = vld [vmem:[%s1582_s1 + $0x40] ss:$8 sps:$4 sm:$0xff]   ;;  %v1080_v15 = vld [vmem:[%s1582_s1 + $0x54] ss:$8 sps:$4 sm:$0xff]  }
   0x6   :  { %477 = vmatprep.subr.bf16.mxu1 %v1095_v12  ;;  %v1101_v16 = vld [vmem:[%s1582_s1 + $0x124] ss:$8 sps:$4 sm:$0xff]   ;;  %v1103_v18 = vld [vmem:[%s1582_s1 + $0x120] ss:$8 sps:$4 sm:$0xff]   ;;  %v1082_v19 = vld [vmem:[%s1582_s1 + $0x50] ss:$8 sps:$4 sm:$0xff]  }
   0x7   :  { %425 = vmatpush1.bf16.msra.mxu0 %v1070_v4  ;;  %v1107_v20 = vld [vmem:[%s1582_s1 + $0x134] ss:$8 sps:$4 sm:$0xff]   ;;  %v1083_v21 = vld [vmem:[%s1582_s1 + $0x64] ss:$8 sps:$4 sm:$0xff]   ;;  %v1254_v22 = vshrl.u32 %v21_v17, 7 }
   0x8   :  { %426 = vmatprep.subr.bf16.mxu0 %v1071_v5  ;;  %v1109_v23 = vld [vmem:[%s1582_s1 + $0x130] ss:$8 sps:$4 sm:$0xff]   ;;  %v1085_v24 = vld [vmem:[%s1582_s1 + $0x60] ss:$8 sps:$4 sm:$0xff]   ;;  %v1113_v25 = vld [vmem:[%s1582_s1 + $0x144] ss:$8 sps:$4 sm:$0xff]  }
   0x9   :  { %478 = vmatpush1.bf16.msra.mxu1 %v1097_v13  ;;  %v1086_v26 = vld [vmem:[%s1582_s1 + $0x74] ss:$8 sps:$4 sm:$0xff]   ;;  %v23_v27 = vadd.s32 8, %v1254_v22  ;;  %v1115_v28 = vld [vmem:[%s1582_s1 + $0x140] ss:$8 sps:$4 sm:$0xff]   ;;  %v25_v33 = vadd.s32 24, %v1254_v22 }
   0xa   :  { %479 = vmatprep.subr.bf16.mxu1 %v1101_v16  ;;  %v1088_v29 = vld [vmem:[%s1582_s1 + $0x70] ss:$8 sps:$4 sm:$0xff]   ;;  %v1119_v30 = vld [vmem:[%s1582_s1 + $0x154] ss:$8 sps:$4 sm:$0xff]   ;;  %v1092_v31 = vld [vmem:[%s1582_s1 + $0x84] ss:$8 sps:$4 sm:$0xff]  }
   0xb   :  { %427 = vmatpush1.bf16.msra.mxu0 %v1073_v6  ;;  %v37_v32 = vand.u32 15, %v23_v27  ;;  %v1094_v34 = vld [vmem:[%s1582_s1 + $0x80] ss:$8 sps:$4 sm:$0xff]   ;;  %v1121_v35 = vld [vmem:[%s1582_s1 + $0x150] ss:$8 sps:$4 sm:$0xff]   ;;  %v51_v42 = vand.u32 15, %v25_v33 }
   0xc   :  { %428 = vmatprep.subr.bf16.mxu0 %v1074_v7  ;;  %v1098_v36 = vld [vmem:[%s1582_s1 + $0x94] ss:$8 sps:$4 sm:$0xff]   ;;  %v1125_v37 = vld [vmem:[%s1582_s1 + $0x164] ss:$8 sps:$4 sm:$0xff]   ;;  %v1100_v43 = vld [vmem:[%s1582_s1 + $0x90] ss:$8 sps:$4 sm:$0xff]  }
   0xd   :  { %480 = vmatpush1.bf16.msra.mxu1 %v1103_v18  ;;  %vm1294_vm0 = vcmp.le.s32.totalorder %v37_v32, 14  ;;  %v1301_v39 = vld [vmem:[%s1583_s0] sm:$0xff]  ;;  %v1306_v40 = vld [vmem:[%s1583_s0 + $0x8] sm:$0xff]  ;;  %v1311_v41 = vld [vmem:[%s1583_s0 + $0x10] sm:$0xff]  ;;  %vm111_vm1 = vcmp.lt.s32.totalorder %v1254_v22, 7  ;;  %vm1349_vm4 = vcmp.le.s32.totalorder %v51_v42, 14 }
   0xe   :  { %481 = vmatprep.subr.bf16.mxu1 %v1107_v20  ;;  %v1127_v44 = vld [vmem:[%s1582_s1 + $0x160] ss:$8 sps:$4 sm:$0xff]   ;;  %v129_v45 = vpack.c.bf16 %v1306_v40, %v1301_v39  ;;  %v107_v46 = vrot.slane %v1301_v39, 1  ;;  %v108_v47 = vrot.slane %v1306_v40, 1  ;;  %v109_v48 = vrot.slane %v1311_v41, 1  ;;  %vm1337_vm3 = vmpackc.low %vm1294_vm0, %vm1162_vm2  ;;  %v1347_v54 = vld [vmem:[%s1583_s0 + $0x18] sm:$0xff] }
   0xf   :  { %429 = vmatpush1.bf16.msra.mxu0 %v1076_v8  ;;  %v1104_v49 = vld [vmem:[%s1582_s1 + $0xa4] ss:$8 sps:$4 sm:$0xff]   ;;  %v1131_v50 = vld [vmem:[%s1582_s1 + $0x174] ss:$8 sps:$4 sm:$0xff]   ;;  %v1133_v51 = vld [vmem:[%s1582_s1 + $0x170] ss:$8 sps:$4 sm:$0xff]  }
  0x10   :  { %430 = vmatprep.subr.bf16.mxu0 %v1077_v11  ;;  %454 = vmatprep.mubr.bf16.mxu0 %v129_v45  ;;  %v1106_v53 = vld [vmem:[%s1582_s1 + $0xa0] ss:$8 sps:$4 sm:$0xff]   ;;  %v1110_v56 = vld [vmem:[%s1582_s1 + $0xb4] ss:$8 sps:$4 sm:$0xff]   ;;  %v113_v57 = vsel %vm111_vm1, %v108_v47, %v109_v48  ;;  %v114_v58 = vsel %vm111_vm1, %v107_v46, %v108_v47  ;;  %v110_v59 = vrot.slane %v1347_v54, 1  ;;  %vm1379_vm5 = vmpackc.low %vm1349_vm4, %vm1162_vm2  ;;  %v86_v12 = vrot.slane %v1301_v39, 7 }
  0x11   :  { %482 = vmatpush1.bf16.msra.mxu1 %v1109_v23  ;;  %v1137_v60 = vld [vmem:[%s1584_s2 + $0x40] sm:$0xff]   ;;  %v1112_v62 = vld [vmem:[%s1582_s1 + $0xb0] ss:$8 sps:$4 sm:$0xff]   ;;  %v951_v63 = vpack.c.bf16 %v113_v57, %v114_v58  ;;  %v1139_v0 = vld [vmem:[%s1584_s2 + $0x48] sm:$0xff]   ;;  %v87_v13 = vrot.slane %v1306_v40, 7  ;;  %v30_v16 = vand.u32 15, %v1254_v22 }
  0x12   :  { %483 = vmatprep.subr.bf16.mxu1 %v1113_v25  ;;  %v1138_v61 = vld [vmem:[%s1584_s2] sm:$0xff]   ;;  %v1140_v4 = vld [vmem:[%s1584_s2 + $0x8] sm:$0xff]   ;;  %v1122_v6 = vld [vmem:[%s1582_s1 + $0xd4] ss:$8 sps:$4 sm:$0xff]   ;;  %v112_v7 = vsel %vm111_vm1, %v109_v48, %v110_v59  ;;  %v115_v8 = vsel %vm111_vm1, %v110_v59, %v107_v46  ;;  %vm90_vm6 = vcmp.lt.s32.totalorder %v1254_v22, 1  ;;  %v24_v20 = vadd.s32 16, %v1254_v22 }
  0x13   :  { %431 = vmatpush1.bf16.msra.mxu0 %v1079_v14  ;;  %v1116_v2 = vld [vmem:[%s1582_s1 + $0xc4] ss:$8 sps:$4 sm:$0xff]   ;;  %v1118_v5 = vld [vmem:[%s1582_s1 + $0xc0] ss:$8 sps:$4 sm:$0xff]   ;;  %v1124_v9 = vld [vmem:[%s1582_s1 + $0xd0] ss:$8 sps:$4 sm:$0xff]   ;;  %v954_v10 = vpack.c.bf16 %v115_v8, %v112_v7  ;;  %v93_v18 = vsel %vm90_vm6, %v86_v12, %v87_v13 }
  0x14   :  { %432 = vmatprep.subr.bf16.mxu0 %v1080_v15  ;;  %v1130_v11 = vld [vmem:[%s1582_s1 + $0xe0] ss:$8 sps:$4 sm:$0xff]   ;;  %v89_v14 = vrot.slane %v1347_v54, 7  ;;  %v1134_v15 = vld [vmem:[%s1582_s1 + $0xf4] ss:$8 sps:$4 sm:$0xff]   ;;  %vm74_vm7 = vcmp.ge.s32.totalorder %v30_v16, 1 }
  0x15   :  { %484 = vmatpush1.bf16.msra.mxu1 %v1115_v28  ;;  %v1136_v17 = vld [vmem:[%s1582_s1 + $0xf0] ss:$8 sps:$4 sm:$0xff]   ;;  %vm1427_vm8 = vmpackc.low %vm1162_vm2, %vm74_vm7  ;;  %v88_v25 = vrot.slane %v1311_v41, 7  ;;  %v1148_v38 = vld [vmem:[%s1584_s2 + $0x28] sm:$0xff]  }
  0x16   :  { %485 = vmatprep.subr.bf16.mxu1 %v1119_v30  ;;  %v1142_v32 = vld [vmem:[%s1584_s2 + $0x10] sm:$0xff]   ;;  %v1143_v33 = vld [vmem:[%s1584_s2 + $0x58] sm:$0xff]   ;;  %v1157_v23 = vld [vmem:[%s1584_s2 + $0xa0] sm:$0xff]  }
  0x17   :  { %433 = vmatpush1.bf16.msra.mxu0 %v1082_v19  ;;  %v94_v19 = vsel %vm90_vm6, %v89_v14, %v86_v12  ;;  %v91_v27 = vsel %vm90_vm6, %v88_v25, %v89_v14  ;;  %v92_v28 = vsel %vm90_vm6, %v87_v13, %v88_v25  ;;  %v1149_v39 = vld [vmem:[%s1584_s2 + $0x70] sm:$0xff]   ;;  %v1152_v42 = vld [vmem:[%s1584_s2 + $0x38] sm:$0xff]  }
  0x18   :  { %434 = vmatprep.subr.bf16.mxu0 %v1083_v21  ;;  %v945_v21 = vpack.c.bf16 %v93_v18, %v94_v19  ;;  %v1150_v40 = vld [vmem:[%s1584_s2 + $0x30] sm:$0xff]   ;;  %v1156_v22 = vld [vmem:[%s1584_s2 + $0x98] sm:$0xff]  }
  0x19   :  { %486 = vmatpush1.bf16.msra.mxu1 %v1121_v35  ;;  %v1145_v35 = vld [vmem:[%s1584_s2 + $0x60] sm:$0xff]   ;;  %v1159_v30 = vld [vmem:[%s1584_s2 + $0xb0] sm:$0xff]   ;;  %v1160_v52 = vld [vmem:[%s1584_s2 + $0xb8] sm:$0xff]  }
  0x1a   :  { %487 = vmatprep.subr.bf16.mxu1 %v1125_v37  ;;  %v1147_v37 = vld [vmem:[%s1584_s2 + $0x68] sm:$0xff]  }
  0x1b   :  { %435 = vmatpush1.bf16.msra.mxu0 %v1085_v24  ;;  %v132_v24 = vpack.c.bf16 %v1347_v54, %v1311_v41  ;;  %v1151_v41 = vld [vmem:[%s1584_s2 + $0x78] sm:$0xff]   ;;  %v956_v54 = vld [vmem:[%s1585_s3] ss:$0 sm:$0xff] }
  0x1c   :  { %436 = vmatprep.subr.bf16.mxu0 %v1086_v26  ;;  %v44_v26 = vand.u32 15, %v24_v20 }
  0x1d   :  { %488 = vmatpush1.bf16.msra.mxu1 %v1127_v44 }
  0x1e   :  { %489 = vmatprep.subr.bf16.mxu1 %v1131_v50  ;;  %vm76_vm9 = vcmp.ge.s32.totalorder %v44_v26, 1 }
  0x1f   :  { %437 = vmatpush1.bf16.msra.mxu0 %v1088_v29  ;;  %v948_v29 = vpack.c.bf16 %v91_v27, %v92_v28  ;;  %vm1441_vm10 = vmpackc.low %vm1162_vm2, %vm76_vm9 }
  0x20   :  { %438 = vmatprep.subr.bf16.mxu0 %v1092_v31  ;;  %v1141_v31 = vld [vmem:[%s1584_s2 + $0x50] sm:$0xff]  }
  0x21   :  { %490 = vmatpush1.bf16.msra.mxu1 %v1133_v51 }
  0x22   :  { %997 = vmatprep.subr.bf16.mxu1 %v1137_v60 }
  0x23   :  { %439 = vmatpush1.bf16.msra.mxu0 %v1094_v34  ;;  %v1144_v34 = vld [vmem:[%s1584_s2 + $0x18] sm:$0xff]  }
  0x24   :  { %440 = vmatprep.subr.bf16.mxu0 %v1098_v36  ;;  %952 = vmatmul.mubr.msk.bf16.vlgmr.msra.gmra.mrb[0].mxu1 %vm1337_vm3, %v951_v63  ;;  %v1146_v36 = vld [vmem:[%s1584_s2 + $0x20] sm:$0xff]  }
  0x25   :  { %517 = vmatprep.mubr.bf16.mxu1 %v1161_v1  ;;  %998 = vmatpush3.bf16.msra.mxu1 %v1138_v61  ;;  %v1128_v1 = vld [vmem:[%s1582_s1 + $0xe4] ss:$8 sps:$4 sm:$0xff]  }
  0x26   :  { %999 = vmatprep.subr.bf16.mxu1 %v1139_v0 }
  0x27   :  { %441 = vmatpush1.bf16.msra.mxu0 %v1100_v43  ;;  %v1153_v43 = vld [vmem:[%s1584_s2 + $0x80] sm:$0xff]  }
  0x28   :  { %442 = vmatprep.subr.bf16.mxu0 %v1104_v49 }
  0x29   :  { %1000 = vmatpush3.bf16.msra.mxu1 %v1140_v4 }
  0x2a   :  { %1001 = vmatprep.subr.bf16.mxu1 %v1141_v31 }
  0x2b   :  { %443 = vmatpush1.bf16.msra.mxu0 %v1106_v53 }
  0x2c   :  { %444 = vmatprep.subr.bf16.mxu0 %v1110_v56  ;;  %955 = vmatmul.mubr.msk.bf16.gmra.mrb[4].mxu1 %vm1379_vm5, %v954_v10 }
  0x2d   :  { %1002 = vmatpush3.bf16.msra.mxu1 %v1142_v32 }
  0x2e   :  { %1003 = vmatprep.subr.bf16.mxu1 %v1143_v33 }
  0x2f   :  { %445 = vmatpush1.bf16.msra.mxu0 %v1112_v62 }
  0x30   :  { %446 = vmatprep.subr.bf16.mxu0 %v1116_v2 }
  0x31   :  { %1004 = vmatpush3.bf16.msra.mxu1 %v1144_v34 }
  0x32   :  { %1005 = vmatprep.subr.bf16.mxu1 %v1145_v35 }
  0x33   :  { %447 = vmatpush1.bf16.msra.mxu0 %v1118_v5 }
  0x34   :  { %448 = vmatprep.subr.bf16.mxu0 %v1122_v6 }
  0x35   :  { %1006 = vmatpush3.bf16.msra.mxu1 %v1146_v36 }
  0x36   :  { %1007 = vmatprep.subr.bf16.mxu1 %v1147_v37 }
  0x37   :  { %449 = vmatpush1.bf16.msra.mxu0 %v1124_v9 }
  0x38   :  { %450 = vmatprep.subr.bf16.mxu0 %v1128_v1 }
  0x39   :  { %1008 = vmatpush3.bf16.msra.mxu1 %v1148_v38  ;;  %v1154_v38 = vld [vmem:[%s1584_s2 + $0x88] sm:$0xff]  }
  0x3a   :  { %1009 = vmatprep.subr.bf16.mxu1 %v1149_v39 }
  0x3b   :  { %451 = vmatpush1.bf16.msra.mxu0 %v1130_v11 }
  0x3c   :  { %452 = vmatprep.subr.bf16.mxu0 %v1134_v15 }
  0x3d   :  { %1010 = vmatpush3.bf16.msra.mxu1 %v1150_v40 }
  0x3e   :  { %1011 = vmatprep.subr.bf16.mxu1 %v1151_v41  ;;  %v1155_v41 = vld [vmem:[%s1584_s2 + $0x90] sm:$0xff]  }
  0x3f   :  { %453 = vmatpush1.bf16.msra.mxu0 %v1136_v17 }
  0x41   :  { %1012 = vmatpush3.bf16.msra.mxu1 %v1152_v42  ;;  %v1158_v42 = vld [vmem:[%s1584_s2 + $0xa8] sm:$0xff]  }
  0x42   :  { %946 = vmatmul.mubr.msk.bf16.vlgmr.msra.gmra.mrb[0].mxu0 %vm1427_vm8, %v945_v21  ;;  %1035 = vmatprep.subr.bf16.mxu1 %v1153_v43 }
  0x43   :  { %464 = vmatprep.mubr.bf16.mxu0 %v132_v24 }
  0x4a   :  { %949 = vmatmul.mubr.msk.bf16.gmra.mrb[4].mxu0 %vm1441_vm10, %v948_v29 }
  0xf7   :  { %v509_v44 = vpop.f32.mrb[0].mxu1 }
  0xf8   :  { %v511_v45 = vpop.f32.mrb[1].mxu1 }
  0xf9   :  { %v513_v46 = vpop.f32.mrb[2].mxu1 }
  0xfa   :  { %v515_v47 = vpop.f32.mrb[3].mxu1 }
  0xff   :  { %v519_v48 = vpop.f32.mrb[4].mxu1 }
 0x100   :  { %v521_v49 = vpop.f32.mrb[5].mxu1 }
 0x101   :  { %v523_v50 = vpop.f32.mrb[6].mxu1 }
 0x102   :  { %v525_v51 = vpop.f32.mrb[7].mxu1 }
 0x115   :  { %v456_v53 = vpop.f32.mrb[0].mxu0 }
 0x116   :  { %v510_v55 = vadd.f32 %v509_v44, %v456_v53  ;;  %v458_v56 = vpop.f32.mrb[1].mxu0 }
 0x117   :  { %v1489_v57 = vadd.f32 %v511_v45, %v458_v56  ;;  %v460_v58 = vpop.f32.mrb[2].mxu0 }
 0x118   :  { %v535_v59 = vadd.f32 %v956_v54, %v510_v55  ;;  %v514_v60 = vadd.f32 %v513_v46, %v460_v58  ;;  %v462_v61 = vpop.f32.mrb[3].mxu0  ;;  %v865_v58 = vld [vmem:[%s1586_s4 + $0x10] sm:$0xff] }
 0x119   :  { %v1491_v62 = vadd.f32 %v515_v47, %v462_v61 }
 0x11a   :  { %v539_v63 = vmax.f32 %v535_v59, 0.0  ;;  %v536_v0 = vadd.f32 %v956_v54, %v514_v60  ;;  %v863_v60 = vld [vmem:[%s1586_s4] sm:$0xff] }
 0x11c   :  { %v540_v2 = vmax.f32 %v536_v0, 0.0  ;;  %v543_v4 = vrot.slane %v539_v63, 7  ;;  %v555_v5 = vrot.slane %v539_v63, 1  ;;  %v866_v0 = vld [vmem:[%s1586_s4 + $0x18] sm:$0xff] }
 0x11d   :  { %v466_v6 = vpop.f32.mrb[4].mxu0 }
 0x11e   :  { %v544_v7 = vrot.slane %v540_v2, 7  ;;  %v556_v8 = vrot.slane %v540_v2, 1  ;;  %v520_v9 = vadd.f32 %v519_v48, %v466_v6  ;;  %v468_v10 = vpop.f32.mrb[5].mxu0  ;;  %v568_v1 = vpack.c.bf16 %v540_v2, %v539_v63  ;;  %v864_v6 = vld [vmem:[%s1586_s4 + $0x8] sm:$0xff] }
 0x11f   :  { %v1493_v11 = vadd.f32 %v521_v49, %v468_v10  ;;  %v470_v12 = vpop.f32.mrb[6].mxu0 }
 0x120   :  { %v549_v13 = vsel %vm90_vm6, %v543_v4, %v544_v7  ;;  %v537_v14 = vadd.f32 %v956_v54, %v520_v9  ;;  %v524_v15 = vadd.f32 %v523_v50, %v470_v12  ;;  %v472_v16 = vpop.f32.mrb[7].mxu0  ;;  %797 = vmatprep.mubr.bf16.mxu1 %v568_v1  ;;  %v561_v17 = vsel %vm111_vm1, %v555_v5, %v556_v8  ;;  %v993_v1 = vld [vmem:[%s1586_s4 + $0x20] sm:$0xff] }
 0x121   :  { %v1499_v18 = vadd.f32 %v525_v51, %v472_v16 }
 0x122   :  { %v541_v19 = vmax.f32 %v537_v14, 0.0  ;;  %v538_v20 = vadd.f32 %v956_v54, %v524_v15  ;;  %v996_v14 = vld [vmem:[%s1586_s4 + $0x38] sm:$0xff] }
 0x124   :  { %v545_v21 = vrot.slane %v541_v19, 7  ;;  %v557_v24 = vrot.slane %v541_v19, 1  ;;  %v542_v25 = vmax.f32 %v538_v20, 0.0 }
 0x126   :  { %v546_v26 = vrot.slane %v542_v25, 7  ;;  %v558_v27 = vrot.slane %v542_v25, 1  ;;  %v571_v28 = vpack.c.bf16 %v542_v25, %v541_v19  ;;  %v548_v29 = vsel %vm90_vm6, %v544_v7, %v545_v21  ;;  %v995_v7 = vld [vmem:[%s1586_s4 + $0x30] sm:$0xff]  ;;  %v994_v19 = vld [vmem:[%s1586_s4 + $0x28] sm:$0xff] }
 0x127   :  { %v560_v31 = vsel %vm111_vm1, %v556_v8, %v557_v24 }
 0x128   :  { %v550_v32 = vsel %vm90_vm6, %v546_v26, %v543_v4  ;;  %v559_v33 = vsel %vm111_vm1, %v557_v24, %v558_v27  ;;  %v562_v34 = vsel %vm111_vm1, %v558_v27, %v555_v5  ;;  %v547_v35 = vsel %vm90_vm6, %v545_v21, %v546_v26 }
 0x129   :  { %v982_v36 = vpack.c.bf16 %v549_v13, %v550_v32  ;;  %v991_v37 = vpack.c.bf16 %v562_v34, %v559_v33  ;;  %v985_v39 = vpack.c.bf16 %v547_v35, %v548_v29  ;;  %v988_v40 = vpack.c.bf16 %v560_v31, %v561_v17 }
 0x12b   :  { %983 = vmatmul.mubr.msk.bf16.vlgmr.msra.gmra.mrb[8].mxu1 %vm1427_vm8, %v982_v36 }
 0x12c   :  { %1036 = vmatpush3.bf16.msra.mxu1 %v1153_v43  ;;  %805 = vmatprep.mubr.bf16.mxu1 %v571_v28 }
 0x12d   :  { %1037 = vmatprep.subr.bf16.mxu1 %v1154_v38 }
 0x130   :  { %1038 = vmatpush3.bf16.msra.mxu1 %v1154_v38 }
 0x131   :  { %1039 = vmatprep.subr.bf16.mxu1 %v1155_v41 }
 0x133   :  { %986 = vmatmul.mubr.msk.bf16.gmra.mrb[12].mxu1 %vm1441_vm10, %v985_v39 }
 0x134   :  { %1040 = vmatpush3.bf16.msra.mxu1 %v1155_v41  ;;  %1051 = vmatprep.mubr.msk.bf16.mxu1 %vm1337_vm3, %v988_v40 }
 0x135   :  { %1041 = vmatprep.subr.bf16.mxu1 %v1156_v22 }
 0x138   :  { %1042 = vmatpush3.bf16.msra.mxu1 %v1156_v22 }
 0x139   :  { %1043 = vmatprep.subr.bf16.mxu1 %v1157_v23 }
 0x13c   :  { %1044 = vmatpush3.bf16.msra.mxu1 %v1157_v23 }
 0x13d   :  { %1045 = vmatprep.subr.bf16.mxu1 %v1158_v42 }
 0x140   :  { %1046 = vmatpush3.bf16.msra.mxu1 %v1158_v42 }
 0x141   :  { %1047 = vmatprep.subr.bf16.mxu1 %v1159_v30 }
 0x144   :  { %1048 = vmatpush3.bf16.msra.mxu1 %v1159_v30 }
 0x145   :  { %1049 = vmatprep.subr.bf16.mxu1 %v1160_v52 }
 0x148   :  { %1050 = vmatpush3.bf16.msra.mxu1 %v1160_v52 }
 0x14b   :  { %1052 = vmatmul.mubr.msk.bf16.vlgmr.msra.gmra.mrb[16].mxu1 %vm1379_vm5, %v991_v37 }
 0x1fe   :  { %v1013_v43 = vpop.f32.mrb[8].mxu1 }
 0x1ff   :  { %v1014_v44 = vpop.f32.mrb[9].mxu1 }
 0x200   :  { %v1015_v45 = vadd.f32 %v1014_v44, %v1013_v43  ;;  %v1016_v46 = vpop.f32.mrb[10].mxu1 }
 0x201   :  { %v1017_v47 = vpop.f32.mrb[11].mxu1 }
 0x202   :  { %v1018_v48 = vadd.f32 %v1017_v47, %v1016_v46 }
 0x206   :  { %v1019_v49 = vpop.f32.mrb[12].mxu1 }
 0x207   :  { %v1020_v50 = vpop.f32.mrb[13].mxu1 }
 0x208   :  { %v1021_v51 = vadd.f32 %v1020_v50, %v1019_v49  ;;  %v1022_v53 = vpop.f32.mrb[14].mxu1 }
 0x209   :  { %v1023_v54 = vpop.f32.mrb[15].mxu1 }
 0x20a   :  { %v1024_v55 = vadd.f32 %v1023_v54, %v1022_v53 }
 0x21e   :  { %v1053_v56 = vpop.f32.mrb[16].mxu1 }
 0x21f   :  { %v857_v59 = vadd.f32 %v1053_v56, %v1021_v51  ;;  %v848_v3 = vpop.f32.mrb[17].mxu1 }
 0x220   :  { %v849_v61 = vadd.f32 %v1015_v45, %v848_v3  ;;  %v1054_v63 = vpop.f32.mrb[18].mxu1 }
 0x221   :  { %v869_v2 = vmul.f32 %v865_v58, %v857_v59  ;;  %v860_v4 = vadd.f32 %v1054_v63, %v1024_v55  ;;  %v851_v5 = vpop.f32.mrb[19].mxu1 }
 0x222   :  { %v867_v8 = vmul.f32 %v863_v60, %v849_v61  ;;  %v852_v9 = vadd.f32 %v1018_v48, %v851_v5 }
 0x223   :  { %v873_v10 = vadd.f32 %v869_v2, %v1493_v11  ;;  %v870_v12 = vmul.f32 %v866_v0, %v860_v4 }
 0x224   :  { %v871_v13 = vadd.f32 %v867_v8, %v1489_v57  ;;  %v868_v15 = vmul.f32 %v864_v6, %v852_v9 }
 0x225   :  { %v882_v16 = vadd.f32 %v995_v7, %v873_v10  ;;  %v874_v17 = vadd.f32 %v870_v12, %v1499_v18 }
 0x226   :  { %v880_v11 = vadd.f32 %v993_v1, %v871_v13  ;;  %v872_v20 = vadd.f32 %v868_v15, %v1491_v62 }
 0x227   :  { %v886_v21 = vmax.f32 %v882_v16, 0.0  ;;  %v883_v24 = vadd.f32 %v996_v14, %v874_v17 }
 0x228   :  { %v884_v25 = vmax.f32 %v880_v11, 0.0  ;;  %v881_v26 = vadd.f32 %v994_v19, %v872_v20 }
 0x229   :  { %890 = vst [vmem:[%s1587_s5 + $0x10] sm:$0xff] %v886_v21  ;;  %v887_v57 = vmax.f32 %v883_v24, 0.0 }
 0x22a   :  { %888 = vst [vmem:[%s1587_s5] sm:$0xff] %v884_v25  ;;  %v885_v18 = vmax.f32 %v881_v26, 0.0 }
 0x22b   :  { %891 = vst [vmem:[%s1587_s5 + $0x18] sm:$0xff] %v887_v57 }
 0x22c   :  { %889 = vst [vmem:[%s1587_s5 + $0x8] sm:$0xff] %v885_v18 }

</bundles_post_ra>
